<compile_context>
chip_gen: v5e
topology: v5e:2x2
jax: 0.10.0
libtpu: 0.0.40
codegen_flags: <defaults>
</compile_context>

<pallas_src>
import math

import jax
import jax.numpy as jnp
from jax.experimental import pallas as pl
from jax.experimental.pallas import tpu as pltpu


def _decoder_kernel(x_ref, w_ref, b_ref, o_ref):
    # x_ref: (1, feat_in, tile_T)   w_ref: (feat_in, C_pad)   b_ref: (1, C_pad) f32
    # o_ref: (1, tile_T, C_pad)
    x_blk = x_ref[0]                                   # (feat_in, tile_T)
    if x_blk.dtype != w_ref.dtype:
        # In-kernel cast (VPU, hidden under the HBM-bound pipeline) instead of an
        # extra wrapper-side HBM pass over x.
        x_blk = x_blk.astype(w_ref.dtype)
    # Contract over feat_in (MXU transposed-LHS feed): -> (tile_T, C_pad), f32 acc.
    logits = jax.lax.dot_general(
        x_blk, w_ref[...],
        dimension_numbers=(((0,), (0,)), ((), ())),
        preferred_element_type=jnp.float32)
    logits = logits + b_ref[...]                       # f32 bias, pad cols = -1e30
    # Numerically stable log-softmax over the lane-dense, padded class dim.
    m = jnp.max(logits, axis=-1, keepdims=True)
    shifted = logits - m
    lse = jnp.log(jnp.sum(jnp.exp(shifted), axis=-1, keepdims=True))
    o_ref[0] = (shifted - lse).astype(o_ref.dtype)


def prepare_decoder_params(weight, bias, *, matmul_dtype=jnp.bfloat16):
    """One-time (model-load) preparation of the Conv1d parameters:
       weight (num_classes, feat_in) -> padded, transposed (feat_in, C_pad) in
       matmul_dtype; bias -> f32 row with -1e30 in the padded class columns so the
       max/logsumexp over the visible classes is exact."""
    num_classes, feat_in = weight.shape
    c_pad = ((num_classes + 127) // 128) * 128
    w_mat = jnp.zeros((feat_in, c_pad), matmul_dtype)
    w_mat = w_mat.at[:, :num_classes].set(weight.T.astype(matmul_dtype))
    b_row = jnp.full((1, c_pad), -1e30, jnp.float32)   # bias stays f32 (see review)
    b_row = b_row.at[0, :num_classes].set(bias.astype(jnp.float32))
    return w_mat, b_row, num_classes


def jasper_decoder_for_ctc_prepared(x_nct, w_mat, b_row, num_classes, *,
                                    tile_t=1024, out_dtype=jnp.float32,
                                    slice_classes=True):
    """x_nct: (B, feat_in, T) — the last element of encoder_output.
       w_mat/b_row/num_classes: output of prepare_decoder_params.
       Returns (B, T, num_classes) log-probabilities (== PyTorch output after
       its .transpose(1, 2)), or (B, T, C_pad) if slice_classes=False."""
    B, feat_in, T = x_nct.shape
    assert w_mat.shape[0] == feat_in
    c_pad = w_mat.shape[1]

    # Time tiling: one full-T block when it fits, otherwise 128-multiple tiles.
    # T is NOT padded; the last block may be partial (OOB stores are masked).
    if T <= tile_t:
        tile_t_eff = T
    else:
        tile_t_eff = max(128, (min(tile_t, T) // 128) * 128)
    num_t_tiles = pl.cdiv(T, tile_t_eff)

    # v7x has two TensorCores: make sure the ("parallel","parallel") grid has at
    # least two steps for single-batch utterances that are long enough to split.
    if B * num_t_tiles < 2 and T >= 256:
        tile_t_eff = ((pl.cdiv(T, 2) + 127) // 128) * 128
        num_t_tiles = pl.cdiv(T, tile_t_eff)

    grid = (B, num_t_tiles)

    out = pl.pallas_call(
        _decoder_kernel,
        out_shape=jax.ShapeDtypeStruct((B, T, c_pad), out_dtype),
        grid=grid,
        in_specs=[
            pl.BlockSpec((1, feat_in, tile_t_eff), lambda b, t: (b, 0, t)),
            pl.BlockSpec((feat_in, c_pad), lambda b, t: (0, 0)),
            pl.BlockSpec((1, c_pad), lambda b, t: (0, 0)),
        ],
        out_specs=pl.BlockSpec((1, tile_t_eff, c_pad), lambda b, t: (b, t, 0)),
        compiler_params=pltpu.CompilerParams(
            dimension_semantics=("parallel", "parallel")),
    )(x_nct, w_mat, b_row)

    if slice_classes:
        # Cheap lane slice kept for parity with the PyTorch module's output shape;
        # pass slice_classes=False to hand the padded buffer to the consumer.
        out = out[..., :num_classes]
    return out


def jasper_decoder_for_ctc(x_nct, weight, bias, *, matmul_dtype=jnp.bfloat16,
                           tile_t=1024, out_dtype=jnp.float32):
    """Convenience wrapper (prepares params per call).  For the hot path, call
       prepare_decoder_params once at load time and use *_prepared."""
    w_mat, b_row, num_classes = prepare_decoder_params(
        weight, bias, matmul_dtype=matmul_dtype)
    return jasper_decoder_for_ctc_prepared(
        x_nct, w_mat, b_row, num_classes, tile_t=tile_t, out_dtype=out_dtype)


def init_decoder_params(key, feat_in, num_classes):
    """Deterministic analog of the PyTorch init:
       - Conv1d weight (num_classes, feat_in, 1): xavier_uniform_ (gain=1)
       - Conv1d bias: default U(-1/sqrt(fan_in), 1/sqrt(fan_in))"""
    kw, kb = jax.random.split(key)
    fan_in, fan_out = feat_in, num_classes          # kernel_size = 1
    bound_w = math.sqrt(6.0 / (fan_in + fan_out))
    weight = jax.random.uniform(kw, (num_classes, feat_in), jnp.float32,
                                minval=-bound_w, maxval=bound_w)
    bound_b = 1.0 / math.sqrt(fan_in)
    bias = jax.random.uniform(kb, (num_classes,), jnp.float32,
                              minval=-bound_b, maxval=bound_b)
    return weight, bias


def _reference(x_nct, weight, bias):
    # Plain-JAX reference for sanity checks.
    logits = jnp.einsum('bft,cf->bct', x_nct, weight) + bias[None, :, None]
    logp = jax.nn.log_softmax(logits, axis=1)
    return jnp.transpose(logp, (0, 2, 1))


if __name__ == "__main__":
    key = jax.random.PRNGKey(0)
    k_x, k_p, k_x2 = jax.random.split(key, 3)

    # Small shapes consistent with the module's forward (the decoder only uses
    # encoder_output[-1], so we build just that).
    B, feat_in, T, num_classes = 2, 32, 16, 8
    x = jax.random.normal(k_x, (B, feat_in, T), dtype=jnp.float32)
    weight, bias = init_decoder_params(k_p, feat_in, num_classes)

    # --- Check 1: f32 matmul path (tight tolerance), single full-T block. ---
    w32, b32, nc = prepare_decoder_params(weight, bias, matmul_dtype=jnp.float32)
    out = jax.block_until_ready(
        jasper_decoder_for_ctc_prepared(x, w32, b32, nc))
    ref = _reference(x, weight, bias)
    assert out.shape == (B, T, num_classes)
    assert jnp.allclose(out, ref, atol=1e-5, rtol=1e-5)

    # --- Check 2: default bf16 matmul path, multi-tile grid with a PARTIAL
    # (un-padded) last T block.  Compare against a bf16-quantized reference so
    # the check stays tight (bf16 products are exact in f32; acc is f32). ---
    T2 = 300
    x2 = jax.random.normal(k_x2, (B, feat_in, T2), dtype=jnp.float32)
    wbf, bbf, nc = prepare_decoder_params(weight, bias)        # bf16 (default)
    out2 = jax.block_until_ready(
        jasper_decoder_for_ctc_prepared(x2, wbf, bbf, nc, tile_t=128))
    ref2 = _reference(x2.astype(jnp.bfloat16).astype(jnp.float32),
                      weight.astype(jnp.bfloat16).astype(jnp.float32), bias)
    assert out2.shape == (B, T2, num_classes)
    assert jnp.allclose(out2, ref2, atol=2e-3, rtol=2e-3)
    # Loose sanity check against the pure-f32 reference (bf16 matmul error only).
    assert jnp.allclose(out2, _reference(x2, weight, bias), atol=1e-1, rtol=1e-1)

    print("KERNEL_OK")
</pallas_src>

<mosaic_0001>
module attributes {stable_mosaic.version = 11 : i64} {
  func.func @_decoder_kernel(%arg0: i32, %arg1: i32, %arg2: memref<1x32x16xf32, #tpu.memory_space<vmem>>, %arg3: memref<32x128xf32, #tpu.memory_space<vmem>>, %arg4: memref<1x128xf32, #tpu.memory_space<vmem>>, %arg5: memref<1x16x128xf32, #tpu.memory_space<vmem>>) attributes {dimension_semantics = [#tpu.dimension_semantics<parallel>, #tpu.dimension_semantics<parallel>], iteration_bounds = array<i64: 2, 1>, scalar_prefetch = 0 : i64, scratch_operands = 0 : i64, tpu.core_type = #tpu.core_type<tc>, window_params = [{transform_indices = @transform_0, window_bounds = array<i64: 1, 32, 16>}, {pipeline_mode = #tpu.pipeline_mode<synchronous>, transform_indices = @transform_1, window_bounds = array<i64: 32, 128>}, {pipeline_mode = #tpu.pipeline_mode<synchronous>, transform_indices = @transform_2, window_bounds = array<i64: 1, 128>}, {transform_indices = @transform_3, window_bounds = array<i64: 1, 16, 128>}]} {
    %c0 = arith.constant 0 : index
    %c0_0 = arith.constant 0 : index
    %c0_1 = arith.constant 0 : index
    %0 = vector.load %arg2[%c0, %c0_0, %c0_1] : memref<1x32x16xf32, #tpu.memory_space<vmem>>, vector<1x32x16xf32>
    %1 = vector.shape_cast %0 : vector<1x32x16xf32> to vector<32x16xf32>
    %c0_2 = arith.constant 0 : index
    %c0_3 = arith.constant 0 : index
    %2 = vector.load %arg3[%c0_2, %c0_3] : memref<32x128xf32, #tpu.memory_space<vmem>>, vector<32x128xf32>
    %cst = arith.constant dense<0.000000e+00> : vector<16x128xf32>
    %3 = tpu.matmul %1, %2, %cst {dimension_numbers = #tpu.dot_dimension_numbers<[0], [0], [1], [1], [0, 1, 1, 1], [], []>} : vector<32x16xf32>, vector<32x128xf32>, vector<16x128xf32> -> vector<16x128xf32>
    %c0_4 = arith.constant 0 : index
    %c0_5 = arith.constant 0 : index
    %4 = vector.load %arg4[%c0_4, %c0_5] : memref<1x128xf32, #tpu.memory_space<vmem>>, vector<1x128xf32>
    %5 = vector.broadcast %4 : vector<1x128xf32> to vector<16x128xf32>
    %6 = arith.addf %3, %5 : vector<16x128xf32>
    %cst_6 = arith.constant dense<0xFF800000> : vector<16xf32>
    %7 = vector.multi_reduction <maximumf>, %6, %cst_6 [1] : vector<16x128xf32> to vector<16xf32>
    %8 = vector.shape_cast %7 : vector<16xf32> to vector<16x1xf32>
    %9 = vector.broadcast %8 : vector<16x1xf32> to vector<16x128xf32>
    %10 = arith.subf %6, %9 : vector<16x128xf32>
    %11 = math.exp %10 : vector<16x128xf32>
    %cst_7 = arith.constant dense<0.000000e+00> : vector<16xf32>
    %12 = vector.multi_reduction <add>, %11, %cst_7 [1] : vector<16x128xf32> to vector<16xf32>
    %13 = vector.shape_cast %12 : vector<16xf32> to vector<16x1xf32>
    %14 = math.log %13 : vector<16x1xf32>
    %15 = vector.broadcast %14 : vector<16x1xf32> to vector<16x128xf32>
    %16 = arith.subf %10, %15 : vector<16x128xf32>
    %c0_8 = arith.constant 0 : index
    %c0_9 = arith.constant 0 : index
    %c0_10 = arith.constant 0 : index
    %17 = vector.load %arg5[%c0_8, %c0_9, %c0_10] : memref<1x16x128xf32, #tpu.memory_space<vmem>>, vector<1x16x128xf32>
    %18 = vector.shape_cast %17 : vector<1x16x128xf32> to vector<16x128xf32>
    %19 = vector.shape_cast %16 : vector<16x128xf32> to vector<1x16x128xf32>
    tpu.vector_store %arg5[%c0_8, %c0_9, %c0_10], %19 {strides = array<i32>} : memref<1x16x128xf32, #tpu.memory_space<vmem>>, vector<1x16x128xf32>,
    return
  }
  func.func @transform_0(%arg0: i32, %arg1: i32) -> (i32, i32, i32) {
    %c0_i32 = arith.constant 0 : i32
    %c0_i32_0 = arith.constant 0 : i32
    return %arg0, %c0_i32, %arg1 : i32, i32, i32
  }
  func.func @transform_1(%arg0: i32, %arg1: i32) -> (i32, i32) {
    %c0_i32 = arith.constant 0 : i32
    %c0_i32_0 = arith.constant 0 : i32
    %c0_i32_1 = arith.constant 0 : i32
    return %c0_i32, %c0_i32_0 : i32, i32
  }
  func.func @transform_2(%arg0: i32, %arg1: i32) -> (i32, i32) {
    %c0_i32 = arith.constant 0 : i32
    %c0_i32_0 = arith.constant 0 : i32
    %c0_i32_1 = arith.constant 0 : i32
    return %c0_i32, %c0_i32_0 : i32, i32
  }
  func.func @transform_3(%arg0: i32, %arg1: i32) -> (i32, i32, i32) {
    %c0_i32 = arith.constant 0 : i32
    %c0_i32_0 = arith.constant 0 : i32
    return %arg0, %arg1, %c0_i32 : i32, i32, i32
  }
}

</mosaic_0001>

<bundles_post_ra>
// kernel: tpu_custom_call.1
= control target key start
LH: loop header
LB: loop body
LE: loop exit
PB: predicated region body
PF: predicated region fallthrough
CT: control target
= control target key end

     0   :  { %8 = vsyncpa [#allocation3], 0  ;;  %s690_s0 = inlined_call_operand.vmem [shape: f32[2,32,16], index: 0, kind: input, shape index: {}]   ;;  %s691_s1 = inlined_call_operand.vmem [shape: f32[32,128], index: 1, kind: input, shape index: {}]   ;;  %s692_s2 = inlined_call_operand.vmem [shape: f32[1,128], index: 2, kind: input, shape index: {}]   ;;  %s693_s3 = inlined_call_operand.hbm [shape: f32[2,16,128], index: 3, kind: output, shape index: {}]  }
   0x1   :  { %10 = vsyncpa [#allocation3 + $0x1], 0  ;;  %s578_s12 = smov 0   ;;  %s580_s13 = smov 0  }
   0x2   :  { %s582_s14 = smov 0   ;;  %s584_s15 = smov 0  }
   0x3   :  { %s586_s16 = smov 0   ;;  %s588_s17 = smov 0  }
   0x4 LB: > { %s388_s18 = sadd.s32 4294967295, %s554_s17   ;;  %s389_s19 = sadd.s32 4294967294, %s554_s17   ;;  %s554_s17 = sphi %s588_s17, %s16_s17   ;;  %s550_s16 = sphi %s586_s16, %s700_s16   ;;  %s546_s15 = sphi %s584_s15, %s699_s15   ;;  %s542_s14 = sphi %s582_s14, %s698_s14   ;;  %s538_s13 = sphi %s580_s13, %s697_s13   ;;  %s534_s12 = sphi %s578_s12, %s696_s12  }
   0x5   : > { %s28_s20 = sadd.s32 1, %s550_s16  ;;  %s107_s21 = sadd.s32 1, %s542_s14 }
   0x6   : > { %p30_p0 = scmp.ge.s32.totalorder %s28_s20, 2  ;;  %p117_p1 = scmp.ne.s32.totalorder %s542_s14, %s538_s13 }
   0x7   : > { %p118_p2 = scmp.eq.s32.totalorder %s388_s18, 1  ;;  %p123_p3 = scmp.ne.s32.totalorder %s538_s13, %s534_s12 }
   0x8   : > { %s702_s20 = smov (%p30_p0, %s28_s20), 0  ;;  %p124_p5 = scmp.eq.s32.totalorder %s389_s19, 1 }
   0x9   : > { %p618_p4 = por %p118_p2, %p117_p1  ;;  %s102_s23 = ssub.s32 %s550_s16, %s702_s20 }
   0xa   : > { %p392_p6 = scmp.ge.s32.totalorder %s554_s17, 1  ;;  %p105_p7 = scmp.eq.s32.totalorder %s102_s23, 0 }
   0xb   : > { %p625_p8 = por %p124_p5, %p123_p3  ;;  %p159_p9 = scmp.lt.s32.totalorder %s554_s17, 3 }
   0xc   : > { %s631_s25 = scalar_select %p105_p7, %s542_s14, %s107_s21  }
   0xd   : > { %p160_p10 = pnand %p392_p6, %p159_p9 }
   0xe   : > { %p186_p11 = scmp.lt.s32.totalorder (!%p160_p10), %s546_s15, 1  ;;  %s183_s21 = sand.u32 (!%p160_p10), 1, %s538_s13  }
   0xf   : > { %163 = sbr.rel (%p160_p10) target bundleno = 585 (0x249), region = 32  ;;  %s393_s23 = sshll.u32 (!%p160_p10), %s183_s21, 4 }
  0x10   : > { %s404_s26 = sshll.u32 (!%p160_p10), %s546_s15, 4  ;;  %s496_s10 = scalar_lea.hbm (!%p160_p10), %s693_s3, 32 }
  0x11   : > { %s305_s29 = scalar_lea.hbm (!%p160_p10), %s693_s3, %s404_s26 }
  0x12   : > { %s308_s5 = sshll.u32 (!%p160_p10), %s305_s29, 4  ;;  %s309_s5 = int_to_ptr.hbm [resolvable:$true] %s308_s5 }
  0x13   : > { %s490_s7 = sshra.s32 (!%p160_p10), %s309_s5, 4  ;;  %s491_s7 = int_to_ptr.hbm [resolvable:$true] %s490_s7 }
  0x14   : > { %v202_v0 = vld [vmem:[%s691_s1 + $0x18] sm:$0xff]  ;;  %v201_v1 = vld [vmem:[%s691_s1 + $0x10] sm:$0xff]  ;;  %s187_s30 = scalar_select %p186_p11, %s546_s15, 1  ;;  %v200_v2 = vld [vmem:[%s691_s1 + $0x8] sm:$0xff]  ;;  %vm239_vm0 = vcmask 261120  }
  0x15   : > { %258 = vmatpush.msra.mxu0 %v202_v0  ;;  %405 = vmatpush.msra.mxu1 %v202_v0  ;;  %v199_v3 = vld [vmem:[%s691_s1] sm:$0xff]  ;;  %s492_s15 = scalar_lea.hbm %s491_s7, 16  ;;  %p497_p1 = scmp.lt.s32.totalorder %s491_s7, %s693_s3 }
  0x16   : > { %s403_s6 = sshll.u32 %s187_s30, 5  ;;  %v467_v10 = vld [vmem:[%s692_s2] ss:$0 sm:$0xff]  ;;  %s185_s30 = scalar_lea.vmem [#allocation2], %s393_s23 }
  0x17   : > { %259 = vmatpush.msra.mxu0 %v201_v1  ;;  %406 = vmatpush.msra.mxu1 %v201_v1  ;;  %s193_s11 = scalar_lea.vmem %s690_s0, %s403_s6  ;;  %s306_s4 = sshll.u32 %s185_s30, 4  ;;  %s307_s4 = int_to_ptr.vmem [resolvable:$true] %s306_s4 }
  0x18   : > { %v195_v4 = vld [vmem:[%s193_s11] sm:$0xff]  ;;  %v196_v5 = vld [vmem:[%s193_s11 + $0x8] sm:$0xff]  ;;  %v197_v6 = vld [vmem:[%s193_s11 + $0x10] sm:$0xff]  ;;  %s292_s6 = scalar_lea.sflag [#allocation3], %s183_s21  ;;  %p493_p12 = scmp.ne.s32.totalorder %s491_s7, %s492_s15 }
  0x19   : > { %260 = vmatpush.msra.mxu0 %v200_v2  ;;  %407 = vmatpush.msra.mxu1 %v200_v2  ;;  %v198_v7 = vld [vmem:[%s193_s11 + $0x18] sm:$0xff]  ;;  %p498_p2 = scmp.lt.s32.totalorder %s496_s10, %s492_s15 }
  0x1a   : > { %207 = vxpose.xlu0.b32.start [1/4] (short) (narrow) %v195_v4, 16  ;;  %p494_p13 = pnand %p493_p12, %p618_p4 }
  0x1b   : > { %261 = vmatpush.msra.mxu0 %v199_v3  ;;  %408 = vmatpush.msra.mxu1 %v199_v3  ;;  %p499_p3 = por %p498_p2, %p497_p1 }
  0x1c   : > { %p495_p0 = pneg %p494_p13 }
  0x1e   : > { %p500_p5 = pnand %p499_p3, %p495_p0 }
  0x22   : > { %208 = vxpose.xlu0.b32.cont [2/4] (short) (narrow) %v196_v5, 16 }
  0x2a   : > { %209 = vxpose.xlu0.b32.cont [3/4] (short) (narrow) %v197_v6, 16 }
  0x32   : > { %210 = vxpose.xlu0.b32.end [4/4] (short) (narrow) %v198_v7, 16 }
  0xbe   : > { %v223_v8 = vpop.trf.xlu0 }
  0xbf   : > { %396 = vmatmul.msk.f32.vlgmr.msra.gmra.mxu0 %vm239_vm0, %v223_v8 }
  0xc6   : > { %v224_v9 = vpop.trf.xlu0 }
  0xc7   : > { %397 = vmatmul.msk.f32.vlgmr.msra.gmra.mxu1 %vm239_vm0, %v224_v9 }
 0x13c   : > { %v263_v11 = vpop.f32.mrf.mxu0 }
 0x13d   : > { %v264_v12 = vadd.f32 %v467_v10, %v263_v11 }
 0x13f   : > { %269 = vmax.xlane.f32.xlu1 %v264_v12 }
 0x144   : > { %v266_v13 = vpop.f32.mrf.mxu1 }
 0x145   : > { %v267_v14 = vadd.f32 %v467_v10, %v266_v13 }
 0x147   : > { %271 = vmax.xlane.f32.xlu1 %v267_v14 }
 0x1b2   : > { %v270_v15 = vpop.xlane.xlu1 %269 }
 0x1b3   : > { %v273_v16 = vsub.f32 %v264_v12, %v270_v15 }
 0x1b5   : > { %v275_v17 = vmul.f32 1.442695, %v273_v16 }
 0x1b7   : > { %468 = vpow2.f32 %v275_v17 }
 0x1ba   : > { %v272_v18 = vpop.xlane.xlu1 %271 }
 0x1bb   : > { %v274_v19 = vsub.f32 %v267_v14, %v272_v18 }
 0x1bd   : > { %v469_v20 = vpop.eup %468  ;;  %v277_v21 = vmul.f32 1.442695, %v274_v19 }
 0x1be   : > { %279 = vadd.xlane.f32.xlu2 %v469_v20 }
 0x1bf   : > { %470 = vpow2.f32 %v277_v21 }
 0x1c5   : > { %v471_v22 = vpop.eup %470 }
 0x1c6   : > { %281 = vadd.xlane.f32.xlu2 %v471_v22 }
 0x231   : > { %v280_v23 = vpop.xlane.xlu2 %279 }
 0x232   : > { %472 = vlog2.f32 %v280_v23 }
 0x238   : > { %v473_v24 = vpop.eup %472 }
 0x239   : > { %v284_v25 = vmul.f32 0.6931472, %v473_v24  ;;  %v282_v26 = vpop.xlane.xlu2 %281 }
 0x23a   : > { %474 = vlog2.f32 %v282_v26 }
 0x23b   : > { %v287_v27 = vsub.f32 %v273_v16, %v284_v25 }
 0x23d   : > { %289 = vst [vmem:[%s185_s30] sm:$0xff] %v287_v27 }
 0x240   : > { %v475_v28 = vpop.eup %474 }
 0x241   : > { %v286_v29 = vmul.f32 0.6931472, %v475_v28 }
 0x243   : > { %v288_v30 = vsub.f32 %v274_v19, %v286_v29 }
 0x245   : > { %290 = vst [vmem:[%s185_s30 + $0x8] sm:$0xff] %v288_v30 }
 0x246   : > { %503 = shalt.err (!%p500_p5)
}
 0x247   : > { %s556_s19 = smov 128   ;;  %s557_s21 = smov 8  }
 0x248   : > { %409 = dma.vmem_to_hbm [thread:$0]  (%p618_p4), %s307_s4, 256, %s309_s5, %s292_s6, %s556_s19, %s556_s19, %s557_s21  }
 0x249 PF: > { %p415_p6 = scmp.ge.s32.totalorder %s554_s17, 2  ;;  %s323_s23 = sand.u32 1, %s534_s12  }
 0x24a   : > { %s324_s26 = scalar_lea.sflag [#allocation3], %s323_s23 }
 0x24b   : > { %p412_p7 = pnand %p415_p6, %p625_p8 }
 0x24d   : > { %p413_p9 = pneg %p412_p7 }
 0x24f   : > { %529 = dma.done.wait (%p413_p9), %s324_s26, 256  }
 0x250   : > { %531 = vsyncadd (%p413_p9), %s324_s26, 4294967040  ;;  %s16_s17 = sadd.s32 1, %s554_s17   ;;  %s696_s12 = smov %s538_s13 }
 0x251   : > { %p13_p10 = scmp.ge.s32.totalorder %s16_s17, 4   ;;  %s697_s13 = smov %s542_s14 }
 0x252   : > { %s698_s14 = smov %s631_s25  ;;  %s699_s15 = smov %s550_s16 }
 0x253   : > { %s700_s16 = smov %s702_s20  ;;  %15 = sbr.rel (!%p13_p10) target bundleno = 4 (0x4), region = 67 }
 0x258   :  { %330 = vsyncpa [#allocation3], 1 }
 0x259   :  { %332 = vsyncpa [#allocation3 + $0x1], 1 }

</bundles_post_ra>
